<compile_context>
chip_gen: v6e
topology: v6e:2x2x1
jax: 0.10.0
libtpu: 0.0.40
codegen_flags: <defaults>
</compile_context>

<pallas_src>
import jax
import jax.numpy as jnp
from jax.experimental import pallas as pl
from jax.experimental.pallas import tpu as pltpu


def make_rnn_chunk_kernel(t_c, batch):
    """Fused RNN-chunk + linear-head kernel. One grid step == t_c time steps."""

    def kernel(e_ref, whh_ref, wlin_ref, blin_ref, h0_ref,
               out_ref, hfin_ref, h_scratch):
        c = pl.program_id(0)

        @pl.when(c == 0)
        def _():
            h_scratch[...] = h0_ref[...]

        whh = whh_ref[...]            # (H, H), resident, compute dtype
        h = h_scratch[...]            # (B, H), f32 carry across chunks

        ys = []
        for i in range(t_c):          # static, fully unrolled chunk loop
            # e_t already contains x_t @ W_ih^T + b_ih + b_hh (folded in wrapper),
            # so the serial critical path is one matmul + one add + tanh.
            e_t = e_ref[i].astype(jnp.float32)                       # (B, H)
            h = jnp.tanh(
                e_t + jnp.dot(h.astype(whh.dtype), whh,
                              preferred_element_type=jnp.float32))
            ys.append(h.astype(wlin_ref.dtype))

        h_scratch[...] = h

        # Fused linear head for the whole chunk: one (T_c*B, H) @ (H, V) matmul,
        # written as a lane-dense slab of the flat (S*B, V) output.
        y_chunk = jnp.concatenate(ys, axis=0)                        # (T_c*B, H)
        out_ref[...] = (
            jnp.dot(y_chunk, wlin_ref[...], preferred_element_type=jnp.float32)
            + blin_ref[...]
        ).astype(out_ref.dtype)

        @pl.when(c == pl.num_programs(0) - 1)
        def _():
            hfin_ref[...] = h

    return kernel


def _pick_time_chunk(seq_len, target):
    """Largest divisor of seq_len that is <= target."""
    t = max(1, min(target, seq_len))
    while seq_len % t != 0:
        t -= 1
    return t


def rnn_model_forward(inputs, state, params, vocab_size, *,
                      compute_dtype=jnp.float32, time_chunk=8):
    """Pallas equivalent of RNNModel.forward.

    inputs: (batch, seq) int token ids
    state : (1, batch, hidden) float32  (nn.RNN hidden state)
    returns (output, new_state) with output shape (seq*batch, vocab).
    """
    W_ih = params["W_ih"]     # (H, V)  like torch weight_ih_l0
    W_hh = params["W_hh"]     # (H, H)  like torch weight_hh_l0
    b_ih = params["b_ih"]     # (H,)
    b_hh = params["b_hh"]     # (H,)
    W_lin = params["W_lin"]   # (V, H)  like torch nn.Linear.weight
    b_lin = params["b_lin"]   # (V,)

    B, S = inputs.shape
    H = W_hh.shape[0]
    V = vocab_size

    T_c = _pick_time_chunk(S, time_chunk)
    n_chunks = S // T_c

    # Glue: one_hot(x_t) @ W_ih^T is a pure row gather of W_ih^T.  Fold both RNN
    # biases into the gathered rows so the kernel step is tanh(e_t + h @ W_hh^T).
    emb = (W_ih.T.astype(jnp.float32)[inputs.T]
           + (b_ih + b_hh).astype(jnp.float32))                     # (S, B, H)
    E = emb.astype(compute_dtype)

    h0 = state[0].astype(jnp.float32)                               # (B, H)
    whh_t = W_hh.T.astype(compute_dtype)                            # (H, H)
    wlin_t = W_lin.T.astype(compute_dtype)                          # (H, V)
    blin = b_lin.reshape(1, V).astype(jnp.float32)                  # (1, V)

    kernel = make_rnn_chunk_kernel(T_c, B)

    out, h_fin = pl.pallas_call(
        kernel,
        grid=(n_chunks,),
        in_specs=[
            pl.BlockSpec((T_c, B, H), lambda c: (c, 0, 0)),   # embedding chunk
            pl.BlockSpec((H, H), lambda c: (0, 0)),            # W_hh^T (resident)
            pl.BlockSpec((H, V), lambda c: (0, 0)),            # W_lin^T (resident)
            pl.BlockSpec((1, V), lambda c: (0, 0)),            # b_lin
            pl.BlockSpec((B, H), lambda c: (0, 0)),            # h0
        ],
        out_specs=[
            pl.BlockSpec((T_c * B, V), lambda c: (c, 0)),      # logits slab / chunk
            pl.BlockSpec((B, H), lambda c: (0, 0)),            # final hidden
        ],
        out_shape=[
            jax.ShapeDtypeStruct((S * B, V), jnp.float32),
            jax.ShapeDtypeStruct((B, H), jnp.float32),
        ],
        scratch_shapes=[pltpu.VMEM((B, H), jnp.float32)],
        compiler_params=pltpu.CompilerParams(
            dimension_semantics=("arbitrary",)),                # serial recurrence
    )(E, whh_t, wlin_t, blin, h0)

    new_state = h_fin[None]   # (1, B, H)
    return out, new_state


def _reference_forward(inputs, state, params, vocab_size):
    """Pure-JAX reference matching PyTorch semantics (for a sanity check)."""
    X = jax.nn.one_hot(inputs.T, vocab_size, dtype=jnp.float32)  # (S, B, V)
    h = state[0]
    b = params["b_ih"] + params["b_hh"]

    def step(h, x):
        h_new = jnp.tanh(x @ params["W_ih"].T + h @ params["W_hh"].T + b)
        return h_new, h_new

    h_fin, Y = jax.lax.scan(step, h, X)
    out = Y.reshape(-1, Y.shape[-1]) @ params["W_lin"].T + params["b_lin"]
    return out, h_fin[None]


if __name__ == "__main__":
    # Small deterministic config: nn.RNN(vocab_size, num_hiddens), 1 layer, unidirectional.
    batch, seq, vocab_size, num_hiddens = 2, 8, 32, 32

    key = jax.random.PRNGKey(0)
    k_in, k1, k2, k3, k4, k5, k6 = jax.random.split(key, 7)

    bound = 1.0 / jnp.sqrt(num_hiddens)
    params = {
        "W_ih":  jax.random.uniform(k1, (num_hiddens, vocab_size), jnp.float32, -bound, bound),
        "W_hh":  jax.random.uniform(k2, (num_hiddens, num_hiddens), jnp.float32, -bound, bound),
        "b_ih":  jax.random.uniform(k3, (num_hiddens,), jnp.float32, -bound, bound),
        "b_hh":  jax.random.uniform(k4, (num_hiddens,), jnp.float32, -bound, bound),
        "W_lin": jax.random.uniform(k5, (vocab_size, num_hiddens), jnp.float32, -bound, bound),
        "b_lin": jax.random.uniform(k6, (vocab_size,), jnp.float32, -bound, bound),
    }

    inputs = jax.random.randint(k_in, (batch, seq), 0, vocab_size, dtype=jnp.int32)
    state = jnp.zeros((1, batch, num_hiddens), jnp.float32)   # begin_state()

    # f32 path: 2 time-chunks of 4 steps (exercises the cross-chunk hidden carry).
    output, new_state = rnn_model_forward(
        inputs, state, params, vocab_size,
        compute_dtype=jnp.float32, time_chunk=4)
    output = jax.block_until_ready(output)
    new_state = jax.block_until_ready(new_state)

    ref_out, ref_state = _reference_forward(inputs, state, params, vocab_size)
    assert output.shape == (seq * batch, vocab_size)
    assert new_state.shape == (1, batch, num_hiddens)
    assert jnp.allclose(output, ref_out, atol=1e-5, rtol=1e-5)
    assert jnp.allclose(new_state, ref_state, atol=1e-5, rtol=1e-5)

    # bf16 MXU-operand path (perf config): f32 accumulation + f32 tanh, compared
    # against the f32 reference at a bf16-appropriate tolerance.
    out_bf16, state_bf16 = rnn_model_forward(
        inputs, state, params, vocab_size,
        compute_dtype=jnp.bfloat16, time_chunk=4)
    out_bf16 = jax.block_until_ready(out_bf16)
    state_bf16 = jax.block_until_ready(state_bf16)
    assert jnp.allclose(out_bf16, ref_out, atol=1e-1, rtol=1e-1)
    assert jnp.allclose(state_bf16, ref_state, atol=1e-1, rtol=1e-1)

    print("KERNEL_OK")
</pallas_src>

<mosaic_0001>
module attributes {stable_mosaic.version = 11 : i64} {
  func.func @kernel(%arg0: i32, %arg1: memref<4x2x32xf32, #tpu.memory_space<vmem>>, %arg2: memref<32x32xf32, #tpu.memory_space<vmem>>, %arg3: memref<32x32xf32, #tpu.memory_space<vmem>>, %arg4: memref<1x32xf32, #tpu.memory_space<vmem>>, %arg5: memref<2x32xf32, #tpu.memory_space<vmem>>, %arg6: memref<8x32xf32, #tpu.memory_space<vmem>>, %arg7: memref<2x32xf32, #tpu.memory_space<vmem>>, %arg8: memref<2x32xf32, #tpu.memory_space<vmem>>) attributes {dimension_semantics = [#tpu.dimension_semantics<arbitrary>], iteration_bounds = array<i64: 2>, scalar_prefetch = 0 : i64, scratch_operands = 1 : i64, tpu.core_type = #tpu.core_type<tc>, window_params = [{transform_indices = @transform_0, window_bounds = array<i64: 4, 2, 32>}, {pipeline_mode = #tpu.pipeline_mode<synchronous>, transform_indices = @transform_1, window_bounds = array<i64: 32, 32>}, {pipeline_mode = #tpu.pipeline_mode<synchronous>, transform_indices = @transform_2, window_bounds = array<i64: 32, 32>}, {pipeline_mode = #tpu.pipeline_mode<synchronous>, transform_indices = @transform_3, window_bounds = array<i64: 1, 32>}, {pipeline_mode = #tpu.pipeline_mode<synchronous>, transform_indices = @transform_4, window_bounds = array<i64: 2, 32>}, {transform_indices = @transform_5, window_bounds = array<i64: 8, 32>}, {pipeline_mode = #tpu.pipeline_mode<synchronous>, transform_indices = @transform_6, window_bounds = array<i64: 2, 32>}]} {
    %c0_i32 = arith.constant 0 : i32
    %0 = arith.cmpi eq, %arg0, %c0_i32 : i32
    %1 = arith.extui %0 : i1 to i32
    %c0_i32_0 = arith.constant 0 : i32
    %2 = arith.cmpi ne, %1, %c0_i32_0 : i32
    scf.if %2 {
      %c0_26 = arith.constant 0 : index
      %c0_27 = arith.constant 0 : index
      %36 = vector.load %arg5[%c0_26, %c0_27] : memref<2x32xf32, #tpu.memory_space<vmem>>, vector<2x32xf32>
      %c0_28 = arith.constant 0 : index
      %c0_29 = arith.constant 0 : index
      %37 = vector.load %arg8[%c0_28, %c0_29] : memref<2x32xf32, #tpu.memory_space<vmem>>, vector<2x32xf32>
      tpu.vector_store %arg8[%c0_28, %c0_29], %36 {strides = array<i32>} : memref<2x32xf32, #tpu.memory_space<vmem>>, vector<2x32xf32>,
    } else {
    }
    %c0 = arith.constant 0 : index
    %c0_1 = arith.constant 0 : index
    %3 = vector.load %arg2[%c0, %c0_1] : memref<32x32xf32, #tpu.memory_space<vmem>>, vector<32x32xf32>
    %c0_2 = arith.constant 0 : index
    %c0_3 = arith.constant 0 : index
    %4 = vector.load %arg8[%c0_2, %c0_3] : memref<2x32xf32, #tpu.memory_space<vmem>>, vector<2x32xf32>
    %c0_4 = arith.constant 0 : index
    %c0_5 = arith.constant 0 : index
    %c0_6 = arith.constant 0 : index
    %5 = vector.load %arg1[%c0_4, %c0_5, %c0_6] : memref<4x2x32xf32, #tpu.memory_space<vmem>>, vector<1x2x32xf32>
    %6 = vector.shape_cast %5 : vector<1x2x32xf32> to vector<2x32xf32>
    %cst = arith.constant dense<0.000000e+00> : vector<2x32xf32>
    %7 = tpu.matmul %4, %3, %cst {dimension_numbers = #tpu.dot_dimension_numbers<[1], [0], [0], [1], [0, 0, 1, 1], [], []>} : vector<2x32xf32>, vector<32x32xf32>, vector<2x32xf32> -> vector<2x32xf32>
    %8 = arith.addf %6, %7 : vector<2x32xf32>
    %9 = math.tanh %8 : vector<2x32xf32>
    %c1 = arith.constant 1 : index
    %c0_7 = arith.constant 0 : index
    %c0_8 = arith.constant 0 : index
    %10 = vector.load %arg1[%c1, %c0_7, %c0_8] : memref<4x2x32xf32, #tpu.memory_space<vmem>>, vector<1x2x32xf32>
    %11 = vector.shape_cast %10 : vector<1x2x32xf32> to vector<2x32xf32>
    %cst_9 = arith.constant dense<0.000000e+00> : vector<2x32xf32>
    %12 = tpu.matmul %9, %3, %cst_9 {dimension_numbers = #tpu.dot_dimension_numbers<[1], [0], [0], [1], [0, 0, 1, 1], [], []>} : vector<2x32xf32>, vector<32x32xf32>, vector<2x32xf32> -> vector<2x32xf32>
    %13 = arith.addf %11, %12 : vector<2x32xf32>
    %14 = math.tanh %13 : vector<2x32xf32>
    %c2 = arith.constant 2 : index
    %c0_10 = arith.constant 0 : index
    %c0_11 = arith.constant 0 : index
    %15 = vector.load %arg1[%c2, %c0_10, %c0_11] : memref<4x2x32xf32, #tpu.memory_space<vmem>>, vector<1x2x32xf32>
    %16 = vector.shape_cast %15 : vector<1x2x32xf32> to vector<2x32xf32>
    %cst_12 = arith.constant dense<0.000000e+00> : vector<2x32xf32>
    %17 = tpu.matmul %14, %3, %cst_12 {dimension_numbers = #tpu.dot_dimension_numbers<[1], [0], [0], [1], [0, 0, 1, 1], [], []>} : vector<2x32xf32>, vector<32x32xf32>, vector<2x32xf32> -> vector<2x32xf32>
    %18 = arith.addf %16, %17 : vector<2x32xf32>
    %19 = math.tanh %18 : vector<2x32xf32>
    %c3 = arith.constant 3 : index
    %c0_13 = arith.constant 0 : index
    %c0_14 = arith.constant 0 : index
    %20 = vector.load %arg1[%c3, %c0_13, %c0_14] : memref<4x2x32xf32, #tpu.memory_space<vmem>>, vector<1x2x32xf32>
    %21 = vector.shape_cast %20 : vector<1x2x32xf32> to vector<2x32xf32>
    %cst_15 = arith.constant dense<0.000000e+00> : vector<2x32xf32>
    %22 = tpu.matmul %19, %3, %cst_15 {dimension_numbers = #tpu.dot_dimension_numbers<[1], [0], [0], [1], [0, 0, 1, 1], [], []>} : vector<2x32xf32>, vector<32x32xf32>, vector<2x32xf32> -> vector<2x32xf32>
    %23 = arith.addf %21, %22 : vector<2x32xf32>
    %24 = math.tanh %23 : vector<2x32xf32>
    %c0_16 = arith.constant 0 : index
    %c0_17 = arith.constant 0 : index
    %25 = vector.load %arg8[%c0_16, %c0_17] : memref<2x32xf32, #tpu.memory_space<vmem>>, vector<2x32xf32>
    tpu.vector_store %arg8[%c0_16, %c0_17], %24 {strides = array<i32>} : memref<2x32xf32, #tpu.memory_space<vmem>>, vector<2x32xf32>,
    %26 = tpu.concatenate %9, %14, %19, %24 in 0 : vector<2x32xf32>, vector<2x32xf32>, vector<2x32xf32>, vector<2x32xf32> -> vector<8x32xf32>
    %c0_18 = arith.constant 0 : index
    %c0_19 = arith.constant 0 : index
    %27 = vector.load %arg3[%c0_18, %c0_19] : memref<32x32xf32, #tpu.memory_space<vmem>>, vector<32x32xf32>
    %cst_20 = arith.constant dense<0.000000e+00> : vector<8x32xf32>
    %28 = tpu.matmul %26, %27, %cst_20 {dimension_numbers = #tpu.dot_dimension_numbers<[1], [0], [0], [1], [0, 0, 1, 1], [], []>} : vector<8x32xf32>, vector<32x32xf32>, vector<8x32xf32> -> vector<8x32xf32>
    %c0_21 = arith.constant 0 : index
    %c0_22 = arith.constant 0 : index
    %29 = vector.load %arg4[%c0_21, %c0_22] : memref<1x32xf32, #tpu.memory_space<vmem>>, vector<1x32xf32>
    %30 = vector.broadcast %29 : vector<1x32xf32> to vector<8x32xf32>
    %31 = arith.addf %28, %30 : vector<8x32xf32>
    %c0_23 = arith.constant 0 : index
    %c0_24 = arith.constant 0 : index
    %32 = vector.load %arg6[%c0_23, %c0_24] : memref<8x32xf32, #tpu.memory_space<vmem>>, vector<8x32xf32>
    tpu.vector_store %arg6[%c0_23, %c0_24], %31 {strides = array<i32>} : memref<8x32xf32, #tpu.memory_space<vmem>>, vector<8x32xf32>,
    %c1_i32 = arith.constant 1 : i32
    %33 = arith.cmpi eq, %arg0, %c1_i32 : i32
    %34 = arith.extui %33 : i1 to i32
    %c0_i32_25 = arith.constant 0 : i32
    %35 = arith.cmpi ne, %34, %c0_i32_25 : i32
    scf.if %35 {
      %c0_26 = arith.constant 0 : index
      %c0_27 = arith.constant 0 : index
      %36 = vector.load %arg7[%c0_26, %c0_27] : memref<2x32xf32, #tpu.memory_space<vmem>>, vector<2x32xf32>
      tpu.vector_store %arg7[%c0_26, %c0_27], %24 {strides = array<i32>} : memref<2x32xf32, #tpu.memory_space<vmem>>, vector<2x32xf32>,
    } else {
    }
    return
  }
  func.func @transform_0(%arg0: i32) -> (i32, i32, i32) {
    %c0_i32 = arith.constant 0 : i32
    %c0_i32_0 = arith.constant 0 : i32
    %c0_i32_1 = arith.constant 0 : i32
    return %arg0, %c0_i32, %c0_i32_0 : i32, i32, i32
  }
  func.func @transform_1(%arg0: i32) -> (i32, i32) {
    %c0_i32 = arith.constant 0 : i32
    %c0_i32_0 = arith.constant 0 : i32
    %c0_i32_1 = arith.constant 0 : i32
    return %c0_i32, %c0_i32_0 : i32, i32
  }
  func.func @transform_2(%arg0: i32) -> (i32, i32) {
    %c0_i32 = arith.constant 0 : i32
    %c0_i32_0 = arith.constant 0 : i32
    %c0_i32_1 = arith.constant 0 : i32
    return %c0_i32, %c0_i32_0 : i32, i32
  }
  func.func @transform_3(%arg0: i32) -> (i32, i32) {
    %c0_i32 = arith.constant 0 : i32
    %c0_i32_0 = arith.constant 0 : i32
    %c0_i32_1 = arith.constant 0 : i32
    return %c0_i32, %c0_i32_0 : i32, i32
  }
  func.func @transform_4(%arg0: i32) -> (i32, i32) {
    %c0_i32 = arith.constant 0 : i32
    %c0_i32_0 = arith.constant 0 : i32
    %c0_i32_1 = arith.constant 0 : i32
    return %c0_i32, %c0_i32_0 : i32, i32
  }
  func.func @transform_5(%arg0: i32) -> (i32, i32) {
    %c0_i32 = arith.constant 0 : i32
    %c0_i32_0 = arith.constant 0 : i32
    return %arg0, %c0_i32 : i32, i32
  }
  func.func @transform_6(%arg0: i32) -> (i32, i32) {
    %c0_i32 = arith.constant 0 : i32
    %c0_i32_0 = arith.constant 0 : i32
    %c0_i32_1 = arith.constant 0 : i32
    return %c0_i32, %c0_i32_0 : i32, i32
  }
}

</mosaic_0001>

<bundles_post_ra>
// kernel: tpu_custom_call.1
= control target key start
LH: loop header
LB: loop body
LE: loop exit
PB: predicated region body
PF: predicated region fallthrough
CT: control target
= control target key end

     0   :  { %12 = vsyncpa [#allocation4], 0  ;;  %s1513_s0 = inlined_call_operand.hbm [shape: f32[8,2,32], index: 0, kind: input, shape index: {}]   ;;  %s1514_s1 = inlined_call_operand.hbm [shape: f32[32,32], index: 1, kind: input, shape index: {}]   ;;  %s1515_s2 = inlined_call_operand.hbm [shape: f32[32,32], index: 2, kind: input, shape index: {}]   ;;  %s1516_s3 = inlined_call_operand.vmem [shape: f32[1,32], index: 3, kind: input, shape index: {}]   ;;  %s1517_s4 = inlined_call_operand.vmem [shape: f32[2,32], index: 4, kind: input, shape index: {}]   ;;  %s1518_s5 = inlined_call_operand.hbm [shape: f32[16,32], index: 5, kind: output, shape index: {0}]   ;;  %s1519_s6 = inlined_call_operand.hbm [shape: f32[2,32], index: 6, kind: output, shape index: {1}]  }
   0x1   :  { %14 = vsyncpa [#allocation4 + $0x1], 0 }
   0x2   :  { %15 = vsyncpa [#allocation7], 0 }
   0x3   :  { %16 = vsyncpa [#allocation5], 0 }
   0x4   :  { %18 = vsyncpa [#allocation5 + $0x1], 0 }
   0x5   :  { %19 = vsyncpa [#allocation11], 0  ;;  %s1272_s21 = smov 0   ;;  %s1274_s22 = smov 0  }
   0x6   :  { %s1276_s23 = smov 0   ;;  %s1278_s24 = smov 0  }
   0x7 LB: > { %s1293_s25 = sadd.s32 4294967295, %s1224_s24   ;;  %s849_s26 = sadd.s32 4294967294, %s1224_s24   ;;  %s1224_s24 = sphi %s1278_s24, %s1546_s24   ;;  %s1220_s23 = sphi %s1276_s23, %s1545_s23   ;;  %s1216_s22 = sphi %s1274_s22, %s1544_s22   ;;  %s1212_s21 = sphi %s1272_s21, %s1543_s21  }
   0x8   : > { %p45_p0 = scmp.ne.s32.totalorder %s1216_s22, %s1212_s21  ;;  %p1520_p1 = scmp.eq.s32.totalorder %s1293_s25, 0 }
   0x9   : > { %p159_p3 = scmp.eq.s32.totalorder %s849_s26, 1  ;;  %p850_p5 = scmp.ge.s32.totalorder %s1224_s24, 1 }
   0xa   : > { %p1302_p4 = por %p1520_p1, %p45_p0  ;;  %p187_p7 = scmp.lt.s32.totalorder %s1224_s24, 3 }
   0xb   : > { %p1307_p6 = por %p159_p3, %p45_p0  ;;  %s1226_s30 = smov [#allocation6]  }
   0xc   : > { %s1524_s27 = scalar_select %p1302_p4, 1, 0 }
   0xd   : > { %s1525_s28 = scalar_select %p1307_p6, 1, 0 }
   0xe   : > { %p1313_p9 = pnand %p850_p5, %p187_p7  ;;  %s199_s7 = sshll.u32 %s1226_s30, 4  ;;  %s200_s7 = int_to_ptr.vmem [resolvable:$true] %s199_s7 }
   0xf   : > { %s1227_s9 = smov [#allocation8]   ;;  %s1059_s11 = scalar_lea.vmem %s200_s7, 512 }
  0x10   : > { %s1526_s29 = scalar_select %p1313_p9, 1, 0 }
  0x11   : > { %p976_p10 = pneg %p1313_p9  ;;  %s212_s10 = sshll.u32 %s1227_s9, 4  ;;  %s213_s10 = int_to_ptr.vmem [resolvable:$true] %s212_s10 }
  0x12   : > { %p1060_p0 = scmp.ne.s32.totalorder %s200_s7, %s1059_s11  ;;  %p1067_p7 = scmp.lt.s32.totalorder %s200_s7, %s200_s7 }
  0x13   : > { %p1322_p12 = pnand %p976_p10, %p1520_p1  ;;  %p1068_p11 = scmp.lt.s32.totalorder %s1059_s11, %s1059_s11 }
  0x15   : > { %p1050_p13 = pneg %p1322_p12  ;;  %p1069_p8 = por %p1068_p11, %p1067_p7 }
  0x17   : > { %p1062_p3 = pnand %p1060_p0, %p1050_p13 }
  0x19   : > { %p1063_p5 = pneg %p1062_p3 }
  0x1b   : > { %p1070_p10 = pnand %p1069_p8, %p1063_p5 }
  0x1d   : > { %1073 = shalt.err (!%p1070_p10)
}
  0x1e   : > { %s1228_s12 = smov 128   ;;  %s1229_s13 = smov 8  }
  0x1f   : > { %979 = dma.hbm_to_vmem [thread:$0]  (!%p1322_p12), %s1514_s1, 512, %s200_s7, [#allocation7], %s1228_s12, %s1228_s12, %s1229_s13  }
  0x20   : > { %s1085_s16 = scalar_lea.vmem %s213_s10, 512  ;;  %p1093_p2 = scmp.lt.s32.totalorder %s213_s10, %s213_s10 }
  0x21   : > { %p1086_p1 = scmp.ne.s32.totalorder %s213_s10, %s1085_s16  ;;  %p1094_p6 = scmp.lt.s32.totalorder %s1085_s16, %s1085_s16 }
  0x23   : > { %p1088_p0 = pnand %p1086_p1, %p1050_p13  ;;  %p1095_p11 = por %p1094_p6, %p1093_p2 }
  0x25   : > { %p1089_p3 = pneg %p1088_p0 }
  0x27   : > { %p1096_p8 = pnand %p1095_p11, %p1089_p3 }
  0x29   : > { %1099 = shalt.err (!%p1096_p8)
}
  0x2a   : > { %982 = dma.hbm_to_vmem [thread:$0]  (!%p1322_p12), %s1515_s2, 512, %s213_s10, [#allocation7], %s1228_s12, %s1228_s12, %s1229_s13  }
  0x2b   : > { %s1345_s19 = sadd.s32 1, %s1224_s24   ;;  %s32_s20 = sadd.s32 1, %s1220_s23 }
  0x2c   : > { %s29_s26 = ssub.s32 %s1224_s24, %s1345_s19  ;;  %p39_p1 = scmp.ne.s32.totalorder %s1220_s23, %s1216_s22 }
  0x2d   : > { %p30_p2 = scmp.eq.s32.totalorder %s29_s26, 0  ;;  %p40_p6 = scmp.eq.s32.totalorder %s1224_s24, 0 }
  0x2e   : > { %p1528_p13 = scmp.eq.s32.totalorder %s1293_s25, 1  ;;  %p993_p7 = scmp.lt.s32.totalorder %s1224_s24, 2 }
  0x2f   : > { %s1361_s7 = scalar_select %p30_p2, %s1220_s23, %s32_s20  }
  0x30   : > { %p1355_p5 = por %p1528_p13, %p39_p1  ;;  %p41_p10 = por %p40_p6, %p39_p1 }
  0x31   : > { %s232_s8 = sand.u32 1, %s1220_s23   ;;  %s879_s10 = sshll.u32 %s1224_s24, 7 }
  0x32   : > { %s1529_s30 = scalar_select %p1355_p5, 1, 0 }
  0x33   : > { %s854_s9 = sshll.u32 %s232_s8, 3  ;;  %s1368_s13 = scalar_lea.hbm %s1513_s0, %s879_s10 }
  0x34   : > { %s236_s14 = scalar_lea.vmem [#allocation3], %s854_s9  ;;  %p1372_p12 = pnand %p993_p7, %p41_p10 }
  0x35   : > { %s243_s15 = sshll.u32 %s236_s14, 4  ;;  %s1376_s17 = scalar_lea.sflag [#allocation4], %s232_s8  ;;  %s1370_s15 = int_to_ptr.vmem [resolvable:$true] %s243_s15 }
  0x36   : > { %s1100_s18 = scalar_lea.hbm %s1368_s13, 128  ;;  %p1102_p3 = pneg %p1372_p12 }
  0x37   : > { %p1101_p0 = scmp.ne.s32.totalorder %s1368_s13, %s1100_s18  ;;  %s1105_s9 = scalar_lea.hbm %s1513_s0, 256 }
  0x38   : > { %p1106_p1 = scmp.lt.s32.totalorder %s1368_s13, %s1513_s0  ;;  %p1107_p2 = scmp.lt.s32.totalorder %s1105_s9, %s1100_s18 }
  0x39   : > { %p1103_p11 = pnand %p1102_p3, %p1101_p0 }
  0x3a   : > { %p1108_p6 = por %p1107_p2, %p1106_p1 }
  0x3b   : > { %p1104_p8 = pneg %p1103_p11 }
  0x3d   : > { %p1109_p13 = pnand %p1108_p6, %p1104_p8 }
  0x3f   : > { %1112 = shalt.err (!%p1109_p13)
}
  0x40   : > { %s1113_s8 = scalar_lea.vmem %s1370_s15, 128  ;;  %s1230_s12 = smov [#allocation3]  }
  0x41   : > { %p1114_p7 = scmp.ne.s32.totalorder %s1370_s15, %s1113_s8  ;;  %s1118_s14 = sshll.u32 %s1230_s12, 4  ;;  %s1119_s14 = int_to_ptr.vmem [resolvable:$false] %s1118_s14 }
  0x42   : > { %s1120_s20 = scalar_lea.vmem %s1119_s14, 256  ;;  %p1121_p11 = scmp.lt.s32.totalorder %s1370_s15, %s1119_s14 }
  0x43   : > { %p1116_p10 = pnand %p1114_p7, %p1102_p3  ;;  %p1122_p5 = scmp.lt.s32.totalorder %s1120_s20, %s1113_s8 }
  0x45   : > { %p1117_p0 = pneg %p1116_p10  ;;  %p1123_p4 = por %p1122_p5, %p1121_p11 }
  0x47   : > { %p1124_p9 = pnand %p1123_p4, %p1117_p0 }
  0x49   : > { %1127 = shalt.err (!%p1124_p9)
}
  0x4a   : > { %s1231_s18 = smov 32   ;;  %s1232_s26 = smov 2  }
  0x4b   : > { %986 = dma.hbm_to_vmem [thread:$0]  (!%p1372_p12), %s1368_s13, 128, %s1370_s15, %s1376_s17, %s1231_s18, %s1231_s18, %s1232_s26  }
  0x4c   : > { %p1531_p3 = scmp.ne.s32.totalorder %s1526_s29, 0 }
  0x4d   : > { %s1400_s9 = sand.u32 (!%p1531_p3), 1, %s1216_s22   ;;  %p1532_p4 = scmp.ne.s32.totalorder (!%p1531_p3), %s1524_s27, 0 }
  0x4e   : > { %255 = sbr.rel (%p1531_p3) target bundleno = 1185 (0x4a1), region = 40  ;;  %s858_s10 = sshll.u32 (!%p1531_p3), %s1400_s9, 3 }
  0x4f   : > { %s258_s11 = scalar_lea.sflag (!%p1531_p3), [#allocation4], %s1400_s9  ;;  %s1404_s8 = scalar_lea.vmem (!%p1531_p3), [#allocation3], %s858_s10 }
  0x53   : > { %1195 = dma.done.wait (%p1532_p4), %s258_s11, 128  }
  0x54   : > { %1197 = vsyncadd (%p1532_p4), %s258_s11, 4294967168  ;;  %p1533_p9 = scmp.eq.s32.totalorder %s1293_s25, 0 }
  0x56   : > { %1199 = dma.done.wait (%p1533_p9), [#allocation7], 1024   ;;  %p1534_p5 = pmov %p1533_p9 }
  0x57   : > { %s1414_s29 = scalar_lea.vmem [#allocation9], %s858_s10  ;;  %p1535_p12 = scmp.ne.s32.totalorder %s1293_s25, 0 }
  0x58   : > { %1201 = vsyncadd (%p1534_p5), [#allocation7], 4294966272 }
  0x59   : > { %302 = sbr.rel (%p1535_p12) target bundleno = 96 (0x60), region = 56 }
  0x5e   : > { %v303_v0 = vld [vmem:[%s1517_s4] sm:$0x3]  ;;  %vm304_vm0 = vcmask 254976  }
  0x5f   : > { %305 = vst.msk [vmem:[#allocation2] sm:$0x3] %vm304_vm0, %v303_v0 }
  0x60 PF: > { %v309_v1 = vld [vmem:[#allocation6 + $0x18] sm:$0xff]  ;;  %v1233_v2 = vmov 0.0   ;;  %v308_v3 = vld [vmem:[#allocation6 + $0x10] sm:$0xff]  ;;  %vm1234_vm1 = vmmov 0   ;;  %v307_v4 = vld [vmem:[#allocation6 + $0x8] sm:$0xff]  ;;  %vm312_vm2 = vcmask 261120  }
  0x61   : > { %905 = vmatprep.subr.mxu0 %v1233_v2  ;;  %913 = vmatprep.mubr.msk.f32.mxu0 %vm1234_vm1, %v1233_v2  ;;  %v306_v5 = vld [vmem:[#allocation6] sm:$0xff]  ;;  %v311_v7 = vld [vmem:[%s1404_s8] sm:$0x3]  ;;  %v864_v12 = vld [vmem:[%s1404_s8 + $0x2] sm:$0x3]  ;;  %vm628_vm3 = vcmask 1041408  }
  0x62   : > { %906 = vmatpush3.msra.mxu0 %v309_v1  ;;  %916 = vmatprep.subr.mxu1 %v1233_v2  ;;  %v866_v17 = vld [vmem:[%s1404_s8 + $0x4] sm:$0x3]  ;;  %vm630_vm4 = vcmask 1043456   ;;  %v635_v28 = vld [vmem:[#allocation8 + $0x8] sm:$0xff]  ;;  %v634_v29 = vld [vmem:[#allocation8] sm:$0xff]  ;;  %vm619_vm5 = vcmask 254976  }
  0x63   : > { %907 = vmatprep.subr.mxu0 %v1233_v2  ;;  %917 = vmatpush3.msra.mxu1 %v309_v1  ;;  %v637_v26 = vld [vmem:[#allocation8 + $0x18] sm:$0xff]  ;;  %v636_v27 = vld [vmem:[#allocation8 + $0x10] sm:$0xff]  ;;  %vm632_vm6 = vcmask 1045504   ;;  %v870_v37 = vld [vmem:[%s1516_s3] ss:$0 sm:$0xff]  ;;  %p872_p8 = scmp.ne.s32.totalorder %s1293_s25, 1 }
  0x64   : > { %908 = vmatpush3.msra.mxu0 %v308_v3  ;;  %918 = vmatprep.subr.mxu1 %v1233_v2  ;;  %v868_v30 = vld [vmem:[%s1404_s8 + $0x6] sm:$0x3] }
  0x65   : > { %909 = vmatprep.subr.mxu0 %v1233_v2  ;;  %919 = vmatpush3.msra.mxu1 %v308_v3 }
  0x66   : > { %910 = vmatpush3.msra.mxu0 %v307_v4  ;;  %v310_v6 = vld [vmem:[#allocation2] sm:$0x3]  ;;  %920 = vmatprep.subr.mxu1 %v1233_v2 }
  0x67   : > { %911 = vmatprep.subr.mxu0 %v1233_v2  ;;  %921 = vmatpush3.msra.mxu1 %v307_v4 }
  0x68   : > { %912 = vmatpush3.msra.mxu0 %v306_v5  ;;  %922 = vmatprep.subr.mxu1 %v1233_v2 }
  0x69   : > { %914 = vmatmul.mubr.msk.f32.vlgmr.msra.gmra.mxu0 %vm312_vm2, %v310_v6  ;;  %923 = vmatpush3.msra.mxu1 %v306_v5 }
  0x6a   : > { %924 = vmatprep.mubr.msk.f32.mxu1 %vm1234_vm1, %v1233_v2  ;;  %927 = vmatprep.subr.mxu0 %v1233_v2 }
  0x6b   : > { %928 = vmatpush3.msra.mxu0 %v309_v1  ;;  %935 = vmatprep.mubr.msk.f32.mxu0 %vm1234_vm1, %v1233_v2 }
  0x6c   : > { %929 = vmatprep.subr.mxu0 %v1233_v2  ;;  %938 = vmatprep.subr.mxu1 %v1233_v2 }
  0x6d   : > { %930 = vmatpush3.msra.mxu0 %v308_v3 }
  0x6e   : > { %931 = vmatprep.subr.mxu0 %v1233_v2 }
  0x6f   : > { %932 = vmatpush3.msra.mxu0 %v307_v4 }
  0x70   : > { %933 = vmatprep.subr.mxu0 %v1233_v2 }
  0x71   : > { %934 = vmatpush3.msra.mxu0 %v306_v5 }
  0x72   : > { %949 = vmatprep.subr.mxu0 %v1233_v2 }
 0x129   : > { %v382_v8 = vpop.f32.mrf.mxu0 }
 0x12a   : > { %v386_v9 = vadd.f32 %v382_v8, %v311_v7 }
 0x12b   : > { %v915_v10 = vpop.f32.mrf.mxu0 }
 0x12c   : > { %1040 = vtanh.f32 %v386_v9 }
 0x139   : > { %v1041_v11 = vpop.eup %1040 }
 0x13a   : > { %925 = vmatmul.mubr.msk.f32.vlgmr.msra.gmra.mxu1 %vm312_vm2, %v1041_v11 }
 0x13b   : > { %939 = vmatpush3.msra.mxu1 %v309_v1  ;;  %946 = vmatprep.mubr.msk.f32.mxu1 %vm1234_vm1, %v1233_v2 }
 0x13c   : > { %940 = vmatprep.subr.mxu1 %v1233_v2 }
 0x13d   : > { %941 = vmatpush3.msra.mxu1 %v308_v3 }
 0x13e   : > { %942 = vmatprep.subr.mxu1 %v1233_v2 }
 0x13f   : > { %943 = vmatpush3.msra.mxu1 %v307_v4 }
 0x140   : > { %944 = vmatprep.subr.mxu1 %v1233_v2 }
 0x141   : > { %945 = vmatpush3.msra.mxu1 %v306_v5 }
 0x1fa   : > { %v459_v13 = vpop.f32.mrf.mxu1 }
 0x1fb   : > { %v463_v14 = vadd.f32 %v864_v12, %v459_v13 }
 0x1fc   : > { %v926_v15 = vpop.f32.mrf.mxu1 }
 0x1fd   : > { %1042 = vtanh.f32 %v463_v14 }
 0x20a   : > { %v1043_v16 = vpop.eup %1042 }
 0x20b   : > { %936 = vmatmul.mubr.msk.f32.vlgmr.msra.gmra.mxu0 %vm312_vm2, %v1043_v16  ;;  %v621_v21 = vrot.slane %v1043_v16, 6 }
 0x20c   : > { %957 = vmatprep.mubr.msk.f32.mxu0 %vm1234_vm1, %v1233_v2  ;;  %950 = vmatpush3.msra.mxu0 %v637_v26 }
 0x20d   : > { %v629_v24 = vsel %vm628_vm3, %v1041_v11, %v621_v21  ;;  %951 = vmatprep.subr.mxu0 %v1233_v2 }
 0x20e   : > { %952 = vmatpush3.msra.mxu0 %v636_v27 }
 0x20f   : > { %953 = vmatprep.subr.mxu0 %v1233_v2 }
 0x210   : > { %954 = vmatpush3.msra.mxu0 %v635_v28 }
 0x211   : > { %955 = vmatprep.subr.mxu0 %v1233_v2 }
 0x212   : > { %956 = vmatpush3.msra.mxu0 %v634_v29 }
 0x2cb   : > { %v536_v18 = vpop.f32.mrf.mxu0 }
 0x2cc   : > { %v540_v19 = vadd.f32 %v866_v17, %v536_v18 }
 0x2cd   : > { %v937_v20 = vpop.f32.mrf.mxu0 }
 0x2ce   : > { %1044 = vtanh.f32 %v540_v19 }
 0x2db   : > { %v1045_v22 = vpop.eup %1044 }
 0x2dc   : > { %947 = vmatmul.mubr.msk.f32.vlgmr.msra.gmra.mxu1 %vm312_vm2, %v1045_v22  ;;  %v623_v23 = vrot.slane %v1045_v22, 4 }
 0x2de   : > { %v631_v25 = vsel %vm630_vm4, %v629_v24, %v623_v23 }
 0x39c   : > { %v613_v31 = vpop.f32.mrf.mxu1 }
 0x39d   : > { %v617_v32 = vadd.f32 %v868_v30, %v613_v31 }
 0x39e   : > { %v948_v33 = vpop.f32.mrf.mxu1 }
 0x39f   : > { %1046 = vtanh.f32 %v617_v32 }
 0x3ac   : > { %v1047_v34 = vpop.eup %1046 }
 0x3ad   : > { %620 = vst.msk [vmem:[#allocation2] sm:$0x3] %vm619_vm5, %v1047_v34  ;;  %v626_v35 = vrot.slane %v1047_v34, 2 }
 0x3af   : > { %v633_v36 = vsel %vm632_vm6, %v631_v25, %v626_v35 }
 0x3b0   : > { %958 = vmatmul.mubr.msk.f32.vlgmr.msra.gmra.mxu0 %vm312_vm2, %v633_v36 }
 0x46f   : > { %722 = sbr.rel (%p872_p8) target bundleno = 1141 (0x475), region = 60 }
 0x470   : > { %v714_v38 = vpop.f32.mrf.mxu0 }
 0x471   : > { %v715_v39 = vadd.f32 %v870_v37, %v714_v38 }
 0x472   : > { %v959_v40 = vpop.f32.mrf.mxu0 }
 0x473   : > { %718 = vst.msk [vmem:[%s1414_s29] sm:$0xff] %vm312_vm2, %v715_v39 }
 0x474   : > { %723 = vst.msk [vmem:[#allocation10] sm:$0x3] %vm619_vm5, %v1047_v34 }
 0x475 PF: > { %s874_s17 = sshll.u32 %s1293_s25, 7  ;;  %s738_s18 = sshll.u32 %s1414_s29, 4  ;;  %s739_s18 = int_to_ptr.vmem [resolvable:$true] %s738_s18 }
 0x476   : > { %s736_s20 = scalar_lea.hbm %s1518_s5, %s874_s17  ;;  %s725_s26 = scalar_lea.sflag [#allocation5], %s1400_s9 }
 0x477   : > { %s1128_s10 = scalar_lea.vmem %s739_s18, 128  ;;  %p1536_p2 = scmp.ne.s32.totalorder %s1529_s30, 0 }
 0x478   : > { %p1129_p1 = scmp.ne.s32.totalorder %s739_s18, %s1128_s10  ;;  %s1235_s11 = smov [#allocation9]  }
 0x479   : > { %s1132_s8 = sshll.u32 %s1235_s11, 4  ;;  %s1133_s8 = int_to_ptr.vmem [resolvable:$false] %s1132_s8 }
 0x47a   : > { %p1130_p6 = pnand %p1129_p1, %p1536_p2  ;;  %s1134_s13 = scalar_lea.vmem %s1133_s8, 256 }
 0x47b   : > { %p1135_p7 = scmp.lt.s32.totalorder %s739_s18, %s1133_s8  ;;  %p1136_p10 = scmp.lt.s32.totalorder %s1134_s13, %s1128_s10 }
 0x47c   : > { %p1131_p13 = pneg %p1130_p6 }
 0x47d   : > { %p1137_p0 = por %p1136_p10, %p1135_p7 }
 0x47f   : > { %p1138_p11 = pnand %p1137_p0, %p1131_p13 }
 0x481   : > { %1141 = shalt.err (!%p1138_p11)
}
 0x482   : > { %s1142_s15 = scalar_lea.hbm %s736_s20, 128  ;;  %s1146_s27 = scalar_lea.hbm %s1518_s5, 256 }
 0x483   : > { %p1143_p3 = scmp.ne.s32.totalorder %s736_s20, %s1142_s15  ;;  %p1147_p5 = scmp.lt.s32.totalorder %s736_s20, %s1518_s5 }
 0x484   : > { %p1148_p12 = scmp.lt.s32.totalorder %s1146_s27, %s1142_s15 }
 0x485   : > { %p1144_p4 = pnand %p1143_p3, %p1536_p2 }
 0x486   : > { %p1149_p8 = por %p1148_p12, %p1147_p5 }
 0x487   : > { %p1145_p9 = pneg %p1144_p4 }
 0x489   : > { %p1150_p1 = pnand %p1149_p8, %p1145_p9 }
 0x48b   : > { %1153 = shalt.err (!%p1150_p1)
}
 0x48c   : > { %970 = dma.vmem_to_hbm [thread:$0]  (%p1536_p2), %s739_s18, 128, %s736_s20, %s725_s26  }
 0x48d   : > { %s1236_s12 = smov [#allocation10]   ;;  %p1537_p13 = scmp.eq.s32.totalorder %s1293_s25, 1 }
 0x48e   : > { %s749_s14 = sshll.u32 %s1236_s12, 4  ;;  %s750_s14 = int_to_ptr.vmem [resolvable:$true] %s749_s14 }
 0x48f   : > { %s1154_s10 = scalar_lea.vmem %s750_s14, 32  ;;  %p1161_p0 = scmp.lt.s32.totalorder %s750_s14, %s750_s14 }
 0x490   : > { %p1155_p6 = scmp.ne.s32.totalorder %s750_s14, %s1154_s10  ;;  %p1162_p11 = scmp.lt.s32.totalorder %s1154_s10, %s1154_s10 }
 0x492   : > { %p1156_p7 = pnand %p1155_p6, %p1537_p13  ;;  %p1163_p3 = por %p1162_p11, %p1161_p0 }
 0x494   : > { %p1157_p10 = pneg %p1156_p7 }
 0x496   : > { %p1164_p4 = pnand %p1163_p3, %p1157_p10 }
 0x498   : > { %1167 = shalt.err (!%p1164_p4)
}
 0x499   : > { %p1538_p9 = pmov %p1537_p13 }
 0x49b   : > { %972 = dma.vmem_to_hbm [thread:$0]  (%p1538_p9), %s750_s14, 32, %s1519_s6, [#allocation11]  }
 0x49c   : > { %p1539_p2 = pmov %p1538_p9 }
 0x49e   : > { %1203 = dma.done.wait (%p1539_p2), [#allocation11], 32   ;;  %p1540_p5 = pmov %p1539_p2 }
 0x4a0   : > { %1205 = vsyncadd (%p1540_p5), [#allocation11], 4294967264 }
 0x4a1 PF: > { %s765_s30 = sand.u32 1, %s1212_s21   ;;  %p1541_p12 = scmp.ne.s32.totalorder %s1525_s28, 0 }
 0x4a2   : > { %p1542_p8 = scmp.ge.s32.totalorder %s1224_s24, 2  ;;  %s766_s20 = scalar_lea.sflag [#allocation5], %s765_s30 }
 0x4a4   : > { %p988_p1 = pnand %p1542_p8, %p1541_p12 }
 0x4a6   : > { %p989_p6 = pneg %p988_p1 }
 0x4a8   : > { %1207 = dma.done.wait (%p989_p6), %s766_s20, 128  }
 0x4a9   : > { %1209 = vsyncadd (%p989_p6), %s766_s20, 4294967168  ;;  %p22_p13 = scmp.ge.s32.totalorder %s1345_s19, 4   ;;  %s1543_s21 = smov %s1216_s22 }
 0x4aa   : > { %s1544_s22 = smov %s1220_s23  ;;  %s1545_s23 = smov %s1361_s7 }
 0x4ab   : > { %s1546_s24 = smov %s1345_s19  ;;  %24 = sbr.rel (!%p22_p13) target bundleno = 7 (0x7), region = 112 }
 0x4b0   :  { %771 = vsyncpa [#allocation4], 1 }
 0x4b1   :  { %773 = vsyncpa [#allocation4 + $0x1], 1 }
 0x4b2   :  { %774 = vsyncpa [#allocation7], 1 }
 0x4b3   :  { %775 = vsyncpa [#allocation5], 1 }
 0x4b4   :  { %777 = vsyncpa [#allocation5 + $0x1], 1 }
 0x4b5   :  { %778 = vsyncpa [#allocation11], 1 }

</bundles_post_ra>
